<compile_context>
chip_gen: v6e
topology: v6e:2x2x1
jax: 0.10.0
libtpu: 0.0.40
codegen_flags: <defaults>
</compile_context>

<pallas_src>
import jax
import jax.numpy as jnp
from jax.experimental import pallas as pl
from jax.experimental.pallas import tpu as pltpu

LANE = 128
F32 = 4


def _round_up(x, m):
    return ((x + m - 1) // m) * m


def mlp_kernel(x_ref, w1_ref, b1_ref, w2_ref, b2_ref, w3_ref, b3_ref, out_ref):
    # layer_1: Linear + ReLU (MXU matmul, f32 accumulation)
    h1 = jnp.dot(x_ref[...], w1_ref[...], preferred_element_type=jnp.float32)
    h1 = jnp.maximum(h1 + b1_ref[...], 0.0)
    # layer_2: Linear + ReLU
    h2 = jnp.dot(h1, w2_ref[...], preferred_element_type=jnp.float32)
    h2 = jnp.maximum(h2 + b2_ref[...], 0.0)
    # layer_3: Linear. Output is stored at its real width (no 128-lane padding):
    # a (tb, out_dim) f32 block occupies the same vreg count either way, and the
    # narrow store slashes HBM writeback bytes for small out_dim.
    h3 = jnp.dot(h2, w3_ref[...], preferred_element_type=jnp.float32)
    out_ref[...] = h3 + b3_ref[...]


def _choose_tb(padded8, cap):
    """Pick a batch tile (multiple of 8) that ideally divides padded8 exactly."""
    cap = max(8, _round_up(cap, 8))
    if padded8 <= cap:
        return padded8                      # single grid step, no batch padding
    if padded8 % cap == 0:
        return cap
    # Prefer the largest multiple-of-8 divisor of padded8 <= cap, so no batch
    # padding pass / output re-slice pass is needed.
    best = 8
    for d in range(8, cap + 1, 8):
        if padded8 % d == 0:
            best = d
    if best >= max(8, cap // 4):            # still big enough to amortize step overhead
        return best
    return cap                              # fallback: pad batch up to a multiple of cap


def _vmem_limit_bytes(tb, in_dim, h1_dim, h2_dim, out_dim):
    # Narrow f32 tiles pad to 128 lanes in VMEM regardless of logical width.
    tile = lambda rows, cols: rows * _round_up(cols, LANE) * F32
    need = (
        2 * tile(tb, in_dim)                                  # double-buffered x tile
        + 2 * tile(tb, out_dim)                               # double-buffered out tile
        + 2 * (tile(in_dim, h1_dim) + tile(1, h1_dim)
               + tile(h1_dim, h2_dim) + tile(1, h2_dim)
               + tile(h2_dim, out_dim) + tile(1, out_dim))    # resident weights/biases
        + tile(tb, h1_dim) + tile(tb, h2_dim)                 # live h1 / h2 intermediates
    )
    # Headroom for compiler scratch; clamp into [16 MiB, 48 MiB] so the limit is
    # safe on v5e (128 MiB physical) and inside v7x's 64 MiB/TC physical VMEM.
    return int(min(max(need * 3 // 2 + (2 << 20), 16 << 20), 48 << 20))


def my_model_with_activation(x, params, *, block_batch=8192):
    """Forward pass of MyModelWithActivation as one fused Pallas TPU kernel.

    x: [batch, input_dim] float32
    params: dict with w1 [in,h1], b1 [1,h1], w2 [h1,h2], b2 [1,h2],
            w3 [h2,out], b3 [1,out]   (y = x @ W + b == PyTorch x @ W.T + b)
    """
    w1, b1 = params["w1"], params["b1"]
    w2, b2 = params["w2"], params["b2"]
    w3, b3 = params["w3"], params["b3"]

    batch, in_dim = x.shape
    h1_dim = w1.shape[1]
    h2_dim = w2.shape[1]
    out_dim = w3.shape[1]

    padded8 = _round_up(batch, 8)
    if padded8 <= block_batch:
        tb = padded8
    else:
        # Keep >= ~4 grid steps so v7x's two TensorCores both get work via
        # dimension_semantics=("parallel",) (harmless on v5e/v6e).
        cap = min(block_batch, _round_up(-(-padded8 // 4), 8))
        tb = _choose_tb(padded8, cap)
    padded_batch = _round_up(padded8, tb)

    if padded_batch != batch:
        # Only hit for ragged batches (small tail pad); when tb divides the batch
        # this is skipped entirely — no extra HBM pass over x.
        x = jnp.pad(x, ((0, padded_batch - batch), (0, 0)))
    grid = (padded_batch // tb,)

    # Weights/biases: same block every grid step -> DMA'd once, resident in VMEM.
    resident = lambda a: pl.BlockSpec(a.shape, lambda i: (0, 0))

    flops = 2 * padded_batch * (in_dim * h1_dim + h1_dim * h2_dim + h2_dim * out_dim)
    bytes_accessed = F32 * (
        padded_batch * in_dim + padded_batch * out_dim
        + in_dim * h1_dim + h1_dim
        + h1_dim * h2_dim + h2_dim
        + h2_dim * out_dim + out_dim
    )

    out = pl.pallas_call(
        mlp_kernel,
        out_shape=jax.ShapeDtypeStruct((padded_batch, out_dim), jnp.float32),
        grid=grid,
        in_specs=[
            pl.BlockSpec((tb, in_dim), lambda i: (i, 0)),   # x: tiled over batch
            resident(w1), resident(b1),
            resident(w2), resident(b2),
            resident(w3), resident(b3),
        ],
        out_specs=pl.BlockSpec((tb, out_dim), lambda i: (i, 0)),
        compiler_params=pltpu.CompilerParams(
            dimension_semantics=("parallel",),
            vmem_limit_bytes=_vmem_limit_bytes(tb, in_dim, h1_dim, h2_dim, out_dim),
        ),
        cost_estimate=pl.CostEstimate(
            flops=flops, transcendentals=0, bytes_accessed=bytes_accessed),
    )(x, w1, b1, w2, b2, w3, b3)

    if padded_batch != batch:
        out = out[:batch]
    return out


def init_params(key, input_dim, hidden_1, hidden_2, output_dim):
    """Deterministic init mimicking nn.Linear's uniform(-1/sqrt(fan_in), 1/sqrt(fan_in))."""
    ks = jax.random.split(key, 6)

    def linear(kw, kb, fan_in, fan_out):
        bound = 1.0 / jnp.sqrt(fan_in)
        w = jax.random.uniform(kw, (fan_in, fan_out), jnp.float32, -bound, bound)
        b = jax.random.uniform(kb, (1, fan_out), jnp.float32, -bound, bound)
        return w, b

    w1, b1 = linear(ks[0], ks[1], input_dim, hidden_1)
    w2, b2 = linear(ks[2], ks[3], hidden_1, hidden_2)
    w3, b3 = linear(ks[4], ks[5], hidden_2, output_dim)
    return {"w1": w1, "b1": b1, "w2": w2, "b2": b2, "w3": w3, "b3": b3}


def reference_forward(x, p):
    h1 = jnp.maximum(x @ p["w1"] + p["b1"], 0.0)
    h2 = jnp.maximum(h1 @ p["w2"] + p["b2"], 0.0)
    return h2 @ p["w3"] + p["b3"]


if __name__ == "__main__":
    # MyModelWithActivation(input_dim=16, hidden_layer_1=32, hidden_layer_2=16, output_dim=1)
    input_dim, hidden_1, hidden_2, output_dim = 16, 32, 16, 1

    key = jax.random.PRNGKey(0)
    k_x, k_p, k_x2, k_x3 = jax.random.split(key, 4)
    params = init_params(k_p, input_dim, hidden_1, hidden_2, output_dim)

    # Small-batch check (single grid step, no padding, narrow out store).
    batch = 8
    x = jax.random.normal(k_x, (batch, input_dim), dtype=jnp.float32)
    out = jax.block_until_ready(my_model_with_activation(x, params))
    ref = reference_forward(x, params)
    assert out.shape == (batch, output_dim)
    assert jnp.allclose(out, ref, atol=1e-5, rtol=1e-5)

    # Multi-step grid check: batch=520 with a small block cap. 520 is a multiple
    # of 8 and the divisor search picks tb=104 -> grid=(5,), zero batch padding
    # and no output re-slice.
    batch2 = 520
    x2 = jax.random.normal(k_x2, (batch2, input_dim), dtype=jnp.float32)
    out2 = jax.block_until_ready(
        my_model_with_activation(x2, params, block_batch=128))
    ref2 = reference_forward(x2, params)
    assert out2.shape == (batch2, output_dim)
    assert jnp.allclose(out2, ref2, atol=1e-5, rtol=1e-5)

    # Non-multiple-of-8 batch: exercises the small tail pad + output tail slice.
    batch3 = 13
    x3 = jax.random.normal(k_x3, (batch3, input_dim), dtype=jnp.float32)
    out3 = jax.block_until_ready(my_model_with_activation(x3, params))
    ref3 = reference_forward(x3, params)
    assert out3.shape == (batch3, output_dim)
    assert jnp.allclose(out3, ref3, atol=1e-5, rtol=1e-5)

    print("KERNEL_OK")
</pallas_src>

<mosaic_0001>
module attributes {stable_mosaic.version = 11 : i64} {
  func.func @mlp_kernel(%arg0: i32, %arg1: memref<8x16xf32, #tpu.memory_space<vmem>>, %arg2: memref<16x32xf32, #tpu.memory_space<vmem>>, %arg3: memref<1x32xf32, #tpu.memory_space<vmem>>, %arg4: memref<32x16xf32, #tpu.memory_space<vmem>>, %arg5: memref<1x16xf32, #tpu.memory_space<vmem>>, %arg6: memref<16x1xf32, #tpu.memory_space<vmem>>, %arg7: memref<1x1xf32, #tpu.memory_space<vmem>>, %arg8: memref<8x1xf32, #tpu.memory_space<vmem>>) attributes {dimension_semantics = [#tpu.dimension_semantics<parallel>], iteration_bounds = array<i64: 1>, scalar_prefetch = 0 : i64, scratch_operands = 0 : i64, tpu.core_type = #tpu.core_type<tc>, window_params = [{transform_indices = @transform_0, window_bounds = array<i64: 8, 16>}, {pipeline_mode = #tpu.pipeline_mode<synchronous>, transform_indices = @transform_1, window_bounds = array<i64: 16, 32>}, {pipeline_mode = #tpu.pipeline_mode<synchronous>, transform_indices = @transform_2, window_bounds = array<i64: 1, 32>}, {pipeline_mode = #tpu.pipeline_mode<synchronous>, transform_indices = @transform_3, window_bounds = array<i64: 32, 16>}, {pipeline_mode = #tpu.pipeline_mode<synchronous>, transform_indices = @transform_4, window_bounds = array<i64: 1, 16>}, {pipeline_mode = #tpu.pipeline_mode<synchronous>, transform_indices = @transform_5, window_bounds = array<i64: 16, 1>}, {pipeline_mode = #tpu.pipeline_mode<synchronous>, transform_indices = @transform_6, window_bounds = array<i64: 1, 1>}, {transform_indices = @transform_7, window_bounds = array<i64: 8, 1>}]} {
    %c0 = arith.constant 0 : index
    %c0_0 = arith.constant 0 : index
    %0 = vector.load %arg1[%c0, %c0_0] : memref<8x16xf32, #tpu.memory_space<vmem>>, vector<8x16xf32>
    %c0_1 = arith.constant 0 : index
    %c0_2 = arith.constant 0 : index
    %1 = vector.load %arg2[%c0_1, %c0_2] : memref<16x32xf32, #tpu.memory_space<vmem>>, vector<16x32xf32>
    %cst = arith.constant dense<0.000000e+00> : vector<8x32xf32>
    %2 = tpu.matmul %0, %1, %cst {dimension_numbers = #tpu.dot_dimension_numbers<[1], [0], [0], [1], [0, 0, 1, 1], [], []>} : vector<8x16xf32>, vector<16x32xf32>, vector<8x32xf32> -> vector<8x32xf32>
    %c0_3 = arith.constant 0 : index
    %c0_4 = arith.constant 0 : index
    %3 = vector.load %arg3[%c0_3, %c0_4] : memref<1x32xf32, #tpu.memory_space<vmem>>, vector<1x32xf32>
    %4 = vector.broadcast %3 : vector<1x32xf32> to vector<8x32xf32>
    %5 = arith.addf %2, %4 : vector<8x32xf32>
    %cst_5 = arith.constant 0.000000e+00 : f32
    %6 = vector.broadcast %cst_5 : f32 to vector<8x32xf32>
    %7 = arith.maximumf %5, %6 : vector<8x32xf32>
    %c0_6 = arith.constant 0 : index
    %c0_7 = arith.constant 0 : index
    %8 = vector.load %arg4[%c0_6, %c0_7] : memref<32x16xf32, #tpu.memory_space<vmem>>, vector<32x16xf32>
    %cst_8 = arith.constant dense<0.000000e+00> : vector<8x16xf32>
    %9 = tpu.matmul %7, %8, %cst_8 {dimension_numbers = #tpu.dot_dimension_numbers<[1], [0], [0], [1], [0, 0, 1, 1], [], []>} : vector<8x32xf32>, vector<32x16xf32>, vector<8x16xf32> -> vector<8x16xf32>
    %c0_9 = arith.constant 0 : index
    %c0_10 = arith.constant 0 : index
    %10 = vector.load %arg5[%c0_9, %c0_10] : memref<1x16xf32, #tpu.memory_space<vmem>>, vector<1x16xf32>
    %11 = vector.broadcast %10 : vector<1x16xf32> to vector<8x16xf32>
    %12 = arith.addf %9, %11 : vector<8x16xf32>
    %cst_11 = arith.constant 0.000000e+00 : f32
    %13 = vector.broadcast %cst_11 : f32 to vector<8x16xf32>
    %14 = arith.maximumf %12, %13 : vector<8x16xf32>
    %c0_12 = arith.constant 0 : index
    %c0_13 = arith.constant 0 : index
    %15 = vector.load %arg6[%c0_12, %c0_13] : memref<16x1xf32, #tpu.memory_space<vmem>>, vector<16x1xf32>
    %cst_14 = arith.constant dense<0.000000e+00> : vector<8x1xf32>
    %16 = tpu.matmul %14, %15, %cst_14 {dimension_numbers = #tpu.dot_dimension_numbers<[1], [0], [0], [1], [0, 0, 1, 1], [], []>} : vector<8x16xf32>, vector<16x1xf32>, vector<8x1xf32> -> vector<8x1xf32>
    %c0_15 = arith.constant 0 : index
    %c0_16 = arith.constant 0 : index
    %17 = vector.load %arg7[%c0_15, %c0_16] : memref<1x1xf32, #tpu.memory_space<vmem>>, vector<1x1xf32>
    %18 = vector.broadcast %17 : vector<1x1xf32> to vector<8x1xf32>
    %19 = arith.addf %16, %18 : vector<8x1xf32>
    %c0_17 = arith.constant 0 : index
    %c0_18 = arith.constant 0 : index
    %20 = vector.load %arg8[%c0_17, %c0_18] : memref<8x1xf32, #tpu.memory_space<vmem>>, vector<8x1xf32>
    tpu.vector_store %arg8[%c0_17, %c0_18], %19 {strides = array<i32>} : memref<8x1xf32, #tpu.memory_space<vmem>>, vector<8x1xf32>,
    return
  }
  func.func @transform_0(%arg0: i32) -> (i32, i32) {
    %c0_i32 = arith.constant 0 : i32
    %c0_i32_0 = arith.constant 0 : i32
    return %arg0, %c0_i32 : i32, i32
  }
  func.func @transform_1(%arg0: i32) -> (i32, i32) {
    %c0_i32 = arith.constant 0 : i32
    %c0_i32_0 = arith.constant 0 : i32
    %c0_i32_1 = arith.constant 0 : i32
    return %c0_i32, %c0_i32_0 : i32, i32
  }
  func.func @transform_2(%arg0: i32) -> (i32, i32) {
    %c0_i32 = arith.constant 0 : i32
    %c0_i32_0 = arith.constant 0 : i32
    %c0_i32_1 = arith.constant 0 : i32
    return %c0_i32, %c0_i32_0 : i32, i32
  }
  func.func @transform_3(%arg0: i32) -> (i32, i32) {
    %c0_i32 = arith.constant 0 : i32
    %c0_i32_0 = arith.constant 0 : i32
    %c0_i32_1 = arith.constant 0 : i32
    return %c0_i32, %c0_i32_0 : i32, i32
  }
  func.func @transform_4(%arg0: i32) -> (i32, i32) {
    %c0_i32 = arith.constant 0 : i32
    %c0_i32_0 = arith.constant 0 : i32
    %c0_i32_1 = arith.constant 0 : i32
    return %c0_i32, %c0_i32_0 : i32, i32
  }
  func.func @transform_5(%arg0: i32) -> (i32, i32) {
    %c0_i32 = arith.constant 0 : i32
    %c0_i32_0 = arith.constant 0 : i32
    %c0_i32_1 = arith.constant 0 : i32
    return %c0_i32, %c0_i32_0 : i32, i32
  }
  func.func @transform_6(%arg0: i32) -> (i32, i32) {
    %c0_i32 = arith.constant 0 : i32
    %c0_i32_0 = arith.constant 0 : i32
    %c0_i32_1 = arith.constant 0 : i32
    return %c0_i32, %c0_i32_0 : i32, i32
  }
  func.func @transform_7(%arg0: i32) -> (i32, i32) {
    %c0_i32 = arith.constant 0 : i32
    %c0_i32_0 = arith.constant 0 : i32
    return %arg0, %c0_i32 : i32, i32
  }
}

</mosaic_0001>

<bundles_post_ra>
// kernel: tpu_custom_call.1
= control target key start
LH: loop header
LB: loop body
LE: loop exit
PB: predicated region body
PF: predicated region fallthrough
CT: control target
= control target key end

     0   :  { %v331_v0 = vmov 0.0   ;;  %vm332_vm0 = vmmov 0   ;;  %vm38_vm1 = vcmask 130048   ;;  %vm124_vm2 = vcmask 261120   ;;  %s414_s1 = inlined_call_operand.vmem [shape: f32[16,32], index: 1, kind: input, shape index: {}]   ;;  %s415_s0 = inlined_call_operand.vmem [shape: f32[8,16], index: 0, kind: input, shape index: {}]   ;;  %s416_s3 = inlined_call_operand.vmem [shape: f32[32,16], index: 3, kind: input, shape index: {}]   ;;  %s417_s2 = inlined_call_operand.vmem [shape: f32[1,32], index: 2, kind: input, shape index: {}]   ;;  %s418_s5 = inlined_call_operand.vmem [shape: f32[16,1], index: 5, kind: input, shape index: {}]   ;;  %s419_s6 = inlined_call_operand.<no memory space> [shape: f32[1,1], index: 6, kind: input, shape index: {}]   ;;  %s420_s4 = inlined_call_operand.vmem [shape: f32[1,16], index: 4, kind: input, shape index: {}]   ;;  %s421_s7 = inlined_call_operand.vmem [shape: f32[8,1], index: 7, kind: output, shape index: {}]  }
   0x1   :  { %304 = vmatprep.subr.mxu0 %v331_v0  ;;  %v30_v1 = vld [vmem:[%s414_s1 + $0x8] sm:$0xff]  ;;  %v29_v2 = vld [vmem:[%s414_s1] sm:$0xff]  ;;  %308 = vmatprep.mubr.msk.f32.mxu0 %vm332_vm0, %v331_v0  ;;  %v116_v4 = vld [vmem:[%s416_s3 + $0x18] sm:$0xff]  ;;  %v12_v15 = vstv %s419_s6  ;;  %vm281_vm3 = vcmask 7168  }
   0x2   :  { %305 = vmatpush3.msra.mxu0 %v30_v1  ;;  %v28_v3 = vld [vmem:[%s415_s0] sm:$0xff]  ;;  %311 = vmatprep.subr.mxu1 %v331_v0  ;;  %v115_v5 = vld [vmem:[%s416_s3 + $0x10] sm:$0xff]  ;;  %v114_v6 = vld [vmem:[%s416_s3 + $0x8] sm:$0xff]  ;;  %13 = vst [vmem:[#allocation2] sm:$0x1] %v12_v15 }
   0x3   :  { %306 = vmatprep.subr.mxu0 %v331_v0  ;;  %312 = vmatpush3.msra.mxu1 %v116_v4  ;;  %v113_v7 = vld [vmem:[%s416_s3] sm:$0xff]  ;;  %v200_v13 = vld [vmem:[%s418_s5 + $0x8] sm:$0xff] }
   0x4   :  { %307 = vmatpush3.msra.mxu0 %v29_v2  ;;  %313 = vmatprep.subr.mxu1 %v331_v0  ;;  %v287_v8 = vld [vmem:[%s417_s2] ss:$0 sm:$0xff] }
   0x5   :  { %309 = vmatmul.mubr.msk.f32.vlgmr.msra.gmra.mxu0 %vm38_vm1, %v28_v3  ;;  %319 = vmatprep.mubr.msk.f32.mxu1 %vm332_vm0, %v331_v0  ;;  %v199_v14 = vld [vmem:[%s418_s5] sm:$0xff] }
   0x6   :  { %322 = vmatprep.subr.mxu0 %v331_v0  ;;  %326 = vmatprep.mubr.msk.f32.mxu0 %vm332_vm0, %v331_v0  ;;  %v289_v16 = vld [vmem:[%s420_s4] ss:$0 sm:$0xff] }
   0x7   :  { %314 = vmatpush3.msra.mxu1 %v115_v5  ;;  %323 = vmatpush3.msra.mxu0 %v200_v13 }
   0x8   :  { %315 = vmatprep.subr.mxu1 %v331_v0  ;;  %324 = vmatprep.subr.mxu0 %v331_v0 }
   0x9   :  { %316 = vmatpush3.msra.mxu1 %v114_v6  ;;  %325 = vmatpush3.msra.mxu0 %v199_v14  ;;  %v291_v21 = vld [vmem:[#allocation2] ss:$0 sm:$0xff] }
   0xa   :  { %317 = vmatprep.subr.mxu1 %v331_v0 }
   0xb   :  { %318 = vmatpush3.msra.mxu1 %v113_v7 }
  0xc5   :  { %v108_v9 = vpop.f32.mrf.mxu0 }
  0xc6   :  { %v109_v10 = vadd.f32 %v287_v8, %v108_v9 }
  0xc7   :  { %v310_v11 = vpop.f32.mrf.mxu0 }
  0xc8   :  { %v112_v12 = vmax.f32 %v109_v10, 0.0 }
  0xca   :  { %320 = vmatmul.mubr.msk.f32.vlgmr.msra.gmra.mxu1 %vm124_vm2, %v112_v12 }
 0x18a   :  { %v194_v17 = vpop.f32.mrf.mxu1 }
 0x18b   :  { %v195_v18 = vadd.f32 %v289_v16, %v194_v17 }
 0x18c   :  { %v321_v19 = vpop.f32.mrf.mxu1 }
 0x18d   :  { %v198_v20 = vmax.f32 %v195_v18, 0.0 }
 0x18f   :  { %327 = vmatmul.mubr.msk.f32.vlgmr.msra.gmra.mxu0 %vm38_vm1, %v198_v20 }
 0x24f   :  { %v277_v22 = vpop.f32.mrf.mxu0 }
 0x250   :  { %v278_v23 = vadd.f32 %v291_v21, %v277_v22 }
 0x251   :  { %v328_v24 = vpop.f32.mrf.mxu0 }
 0x252   :  { %282 = vst.msk [vmem:[%s421_s7] sm:$0xff] %vm281_vm3, %v278_v23 }

</bundles_post_ra>
